<compile_context>
chip_gen: v7x
topology: tpu7x:2x2x1
jax: 0.10.0
libtpu: 0.0.40
codegen_flags: <defaults>
</compile_context>

<pallas_src>
import jax
import jax.numpy as jnp
from jax.experimental import pallas as pl
from jax.experimental.pallas import tpu as pltpu


def _order_independent_kernel(x_ref, w1_ref, b1_ref, w2_ref, b2_ref,
                              w3_ref, b3_ref, out_ref):
    x = x_ref[...]                                              # [TB, D_in]
    z1 = jnp.tanh(jnp.dot(x, w1_ref[...],
                          preferred_element_type=jnp.float32) + b1_ref[...])
    z2 = jnp.tanh(jnp.dot(z1, w2_ref[...],
                          preferred_element_type=jnp.float32) + b2_ref[...])
    y = jnp.tanh(jnp.dot(z2, w3_ref[...],
                         preferred_element_type=jnp.float32) + b3_ref[...])  # [TB, d_out]

    # log_softmax over dim=1.  y ∈ [-1, 1] (tanh-bounded) so the direct
    # logsumexp (no max-subtraction) is numerically safe; this also saves one
    # XLU cross-lane reduce + one VPU subtract per step.  Padded rows of a
    # partial last tile may be NaN, but every op here is row-wise and Pallas
    # clips the store, so valid rows are unaffected.
    lse = jnp.log(jnp.sum(jnp.exp(y), axis=1, keepdims=True))
    out_ref[...] = y - lse


def prepare_block_diagonal(params, d_out):
    """Build the block-diagonal weights ONCE (hoisted out of the forward path).

    Chunk i of x hits block i of each layer -> one wide matmul per layer.
    """
    w1, b1, w2, b2, w3, b3 = params
    eye = jnp.eye(d_out, dtype=jnp.float32)
    w1_bd = jnp.kron(eye, w1.astype(jnp.float32))              # [D_in,        d_out*h1]
    w2_bd = jnp.kron(eye, w2.astype(jnp.float32))              # [d_out*h1,    d_out*h2]
    w3_bd = jnp.kron(eye, w3.astype(jnp.float32))              # [d_out*h2,    d_out]
    b1_bd = jnp.tile(b1.astype(jnp.float32), (1, d_out))       # [1, d_out*h1]
    b2_bd = jnp.tile(b2.astype(jnp.float32), (1, d_out))       # [1, d_out*h2]
    b3_bd = jnp.tile(b3.astype(jnp.float32), (1, d_out))       # [1, d_out]
    return (w1_bd, b1_bd, w2_bd, b2_bd, w3_bd, b3_bd)


def _round_up(v, m):
    return ((v + m - 1) // m) * m


def _pick_batch_tile(B, batch_tile):
    """Sanitize/choose the batch tile.

    - multiple of 8 (sublane rule) unless it is the full (small) batch,
    - large enough to amortize per-step overhead (default 8192 rows ->
      2 MiB f32 x-tile at D_in=64, fits every generation's scoped VMEM),
    - clamped so the grid has >= 2 steps when B > 8 (feeds both v7x cores).
    """
    if B <= 8:
        return B                    # single full block (block == full dim is legal)
    if batch_tile is None:
        batch_tile = 8192
    tb = _round_up(max(8, min(int(batch_tile), B)), 8)
    tb = min(tb, _round_up(pl.cdiv(B, 2), 8))   # ensure >= 2 grid steps
    return tb


def order_independent_net(x, bd_params, d_out, *, batch_tile=None,
                          bf16_inputs=False):
    """x: [B, D_in].  bd_params: output of prepare_block_diagonal(params, d_out)."""
    B, D_in = x.shape
    assert D_in % d_out == 0, f"{D_in} must be divisible by {d_out}."
    w1_bd, b1_bd, w2_bd, b2_bd, w3_bd, b3_bd = bd_params

    if bf16_inputs:
        # Halve the dominant HBM stream (x); accumulation & softmax stay f32.
        x_in = x.astype(jnp.bfloat16)
        w1_in = w1_bd.astype(jnp.bfloat16)
    else:
        x_in = x.astype(jnp.float32)
        w1_in = w1_bd

    tb = _pick_batch_tile(B, batch_tile)
    grid = (pl.cdiv(B, tb),)

    def resident(a):  # weights/biases: same block every step -> stay in VMEM
        return pl.BlockSpec(a.shape, lambda i: (0, 0))

    return pl.pallas_call(
        _order_independent_kernel,
        out_shape=jax.ShapeDtypeStruct((B, d_out), jnp.float32),
        grid=grid,
        in_specs=[pl.BlockSpec((tb, D_in), lambda i: (i, 0)),
                  resident(w1_in), resident(b1_bd),
                  resident(w2_bd), resident(b2_bd),
                  resident(w3_bd), resident(b3_bd)],
        out_specs=pl.BlockSpec((tb, d_out), lambda i: (i, 0)),
        compiler_params=pltpu.CompilerParams(
            dimension_semantics=("parallel",)),
    )(x_in, w1_in, b1_bd, w2_bd, b2_bd, w3_bd, b3_bd)


def init_params(key, d_in, d_out_seq=1):
    """torch.nn.Linear-style init for the shared per-chunk MLP."""
    h1 = d_in - (d_in - d_out_seq) // 3
    h2 = d_in - (d_in - d_out_seq) // 3 * 2

    def linear(k, fan_in, fan_out):
        kw, kb = jax.random.split(k)
        bound = 1.0 / jnp.sqrt(fan_in)
        w = jax.random.uniform(kw, (fan_in, fan_out), jnp.float32, -bound, bound)
        b = jax.random.uniform(kb, (1, fan_out), jnp.float32, -bound, bound)
        return w, b

    k1, k2, k3 = jax.random.split(key, 3)
    w1, b1 = linear(k1, d_in, h1)
    w2, b2 = linear(k2, h1, h2)
    w3, b3 = linear(k3, h2, d_out_seq)
    return (w1, b1, w2, b2, w3, b3)


def reference(x, params, d_out):
    """Pure-JAX reference of the PyTorch forward (per-chunk loop)."""
    w1, b1, w2, b2, w3, b3 = params
    B, D_in = x.shape
    d = D_in // d_out
    cols = []
    for i in range(d_out):
        xc = x[:, i * d:(i + 1) * d]
        z1 = jnp.tanh(xc @ w1 + b1)
        z2 = jnp.tanh(z1 @ w2 + b2)
        z3 = jnp.tanh(z2 @ w3 + b3)
        cols.append(z3)
    y = jnp.concatenate(cols, axis=1)
    return jax.nn.log_softmax(y, axis=1)


if __name__ == "__main__":
    D_out = 4
    D_in = 64                           # per-chunk d = 16 -> h1 = 11, h2 = 6
    d_chunk = D_in // D_out

    key = jax.random.PRNGKey(0)
    kx1, kx2, kp = jax.random.split(key, 3)
    params = init_params(kp, d_chunk)
    bd_params = prepare_block_diagonal(params, D_out)   # built once, reused

    # Case 1: divisible batch; auto tile -> 8 rows -> 2-step grid
    # (resident weights + streamed x, both v7x cores get a step).
    B1 = 16
    x1 = jax.random.normal(kx1, (B1, D_in), jnp.float32)
    out1 = jax.block_until_ready(order_independent_net(x1, bd_params, D_out))
    ref1 = reference(x1, params, D_out)
    assert out1.shape == (B1, D_out)
    assert jnp.isfinite(out1).all(), "non-finite values leaked into valid rows"
    assert jnp.allclose(out1, ref1, atol=1e-5, rtol=1e-5), "mismatch vs reference (case 1)"

    # Case 2: non-divisible batch (padded last block) + user tile that is not a
    # multiple of 8 (sanitized in the wrapper).
    B2 = 20
    x2 = jax.random.normal(kx2, (B2, D_in), jnp.float32)
    out2 = jax.block_until_ready(
        order_independent_net(x2, bd_params, D_out, batch_tile=6))
    ref2 = reference(x2, params, D_out)
    assert out2.shape == (B2, D_out)
    assert jnp.isfinite(out2).all(), "non-finite values leaked into valid rows"
    assert jnp.allclose(out2, ref2, atol=1e-5, rtol=1e-5), "mismatch vs reference (case 2)"

    # Case 3: bf16 input fast path (halves the x HBM stream); looser tolerance.
    out3 = jax.block_until_ready(
        order_independent_net(x1, bd_params, D_out, bf16_inputs=True))
    assert jnp.allclose(out3, ref1, atol=5e-2, rtol=5e-2), "bf16 path diverged too far"

    print("KERNEL_OK")
</pallas_src>

<mosaic_0001>
module attributes {stable_mosaic.version = 11 : i64} {
  func.func @_order_independent_kernel(%arg0: i32, %arg1: memref<8x64xf32, #tpu.memory_space<vmem>>, %arg2: memref<64x44xf32, #tpu.memory_space<vmem>>, %arg3: memref<1x44xf32, #tpu.memory_space<vmem>>, %arg4: memref<44x24xf32, #tpu.memory_space<vmem>>, %arg5: memref<1x24xf32, #tpu.memory_space<vmem>>, %arg6: memref<24x4xf32, #tpu.memory_space<vmem>>, %arg7: memref<1x4xf32, #tpu.memory_space<vmem>>, %arg8: memref<8x4xf32, #tpu.memory_space<vmem>>) attributes {dimension_semantics = [#tpu.dimension_semantics<parallel>], iteration_bounds = array<i64: 2>, scalar_prefetch = 0 : i64, scratch_operands = 0 : i64, tpu.core_type = #tpu.core_type<tc>, window_params = [{transform_indices = @transform_0, window_bounds = array<i64: 8, 64>}, {pipeline_mode = #tpu.pipeline_mode<synchronous>, transform_indices = @transform_1, window_bounds = array<i64: 64, 44>}, {pipeline_mode = #tpu.pipeline_mode<synchronous>, transform_indices = @transform_2, window_bounds = array<i64: 1, 44>}, {pipeline_mode = #tpu.pipeline_mode<synchronous>, transform_indices = @transform_3, window_bounds = array<i64: 44, 24>}, {pipeline_mode = #tpu.pipeline_mode<synchronous>, transform_indices = @transform_4, window_bounds = array<i64: 1, 24>}, {pipeline_mode = #tpu.pipeline_mode<synchronous>, transform_indices = @transform_5, window_bounds = array<i64: 24, 4>}, {pipeline_mode = #tpu.pipeline_mode<synchronous>, transform_indices = @transform_6, window_bounds = array<i64: 1, 4>}, {transform_indices = @transform_7, window_bounds = array<i64: 8, 4>}]} {
    %c0 = arith.constant 0 : index
    %c0_0 = arith.constant 0 : index
    %0 = vector.load %arg1[%c0, %c0_0] : memref<8x64xf32, #tpu.memory_space<vmem>>, vector<8x64xf32>
    %c0_1 = arith.constant 0 : index
    %c0_2 = arith.constant 0 : index
    %1 = vector.load %arg2[%c0_1, %c0_2] : memref<64x44xf32, #tpu.memory_space<vmem>>, vector<64x44xf32>
    %cst = arith.constant dense<0.000000e+00> : vector<8x44xf32>
    %2 = tpu.matmul %0, %1, %cst {dimension_numbers = #tpu.dot_dimension_numbers<[1], [0], [0], [1], [0, 0, 1, 1], [], []>} : vector<8x64xf32>, vector<64x44xf32>, vector<8x44xf32> -> vector<8x44xf32>
    %c0_3 = arith.constant 0 : index
    %c0_4 = arith.constant 0 : index
    %3 = vector.load %arg3[%c0_3, %c0_4] : memref<1x44xf32, #tpu.memory_space<vmem>>, vector<1x44xf32>
    %4 = vector.broadcast %3 : vector<1x44xf32> to vector<8x44xf32>
    %5 = arith.addf %2, %4 : vector<8x44xf32>
    %6 = math.tanh %5 : vector<8x44xf32>
    %c0_5 = arith.constant 0 : index
    %c0_6 = arith.constant 0 : index
    %7 = vector.load %arg4[%c0_5, %c0_6] : memref<44x24xf32, #tpu.memory_space<vmem>>, vector<44x24xf32>
    %cst_7 = arith.constant dense<0.000000e+00> : vector<8x24xf32>
    %8 = tpu.matmul %6, %7, %cst_7 {dimension_numbers = #tpu.dot_dimension_numbers<[1], [0], [0], [1], [0, 0, 1, 1], [], []>} : vector<8x44xf32>, vector<44x24xf32>, vector<8x24xf32> -> vector<8x24xf32>
    %c0_8 = arith.constant 0 : index
    %c0_9 = arith.constant 0 : index
    %9 = vector.load %arg5[%c0_8, %c0_9] : memref<1x24xf32, #tpu.memory_space<vmem>>, vector<1x24xf32>
    %10 = vector.broadcast %9 : vector<1x24xf32> to vector<8x24xf32>
    %11 = arith.addf %8, %10 : vector<8x24xf32>
    %12 = math.tanh %11 : vector<8x24xf32>
    %c0_10 = arith.constant 0 : index
    %c0_11 = arith.constant 0 : index
    %13 = vector.load %arg6[%c0_10, %c0_11] : memref<24x4xf32, #tpu.memory_space<vmem>>, vector<24x4xf32>
    %cst_12 = arith.constant dense<0.000000e+00> : vector<8x4xf32>
    %14 = tpu.matmul %12, %13, %cst_12 {dimension_numbers = #tpu.dot_dimension_numbers<[1], [0], [0], [1], [0, 0, 1, 1], [], []>} : vector<8x24xf32>, vector<24x4xf32>, vector<8x4xf32> -> vector<8x4xf32>
    %c0_13 = arith.constant 0 : index
    %c0_14 = arith.constant 0 : index
    %15 = vector.load %arg7[%c0_13, %c0_14] : memref<1x4xf32, #tpu.memory_space<vmem>>, vector<1x4xf32>
    %16 = vector.broadcast %15 : vector<1x4xf32> to vector<8x4xf32>
    %17 = arith.addf %14, %16 : vector<8x4xf32>
    %18 = math.tanh %17 : vector<8x4xf32>
    %19 = math.exp %18 : vector<8x4xf32>
    %cst_15 = arith.constant dense<0.000000e+00> : vector<8xf32>
    %20 = vector.multi_reduction <add>, %19, %cst_15 [1] : vector<8x4xf32> to vector<8xf32>
    %21 = vector.shape_cast %20 : vector<8xf32> to vector<8x1xf32>
    %22 = math.log %21 : vector<8x1xf32>
    %23 = vector.broadcast %22 : vector<8x1xf32> to vector<8x4xf32>
    %24 = arith.subf %18, %23 : vector<8x4xf32>
    %c0_16 = arith.constant 0 : index
    %c0_17 = arith.constant 0 : index
    %25 = vector.load %arg8[%c0_16, %c0_17] : memref<8x4xf32, #tpu.memory_space<vmem>>, vector<8x4xf32>
    tpu.vector_store %arg8[%c0_16, %c0_17], %24 {strides = array<i32>} : memref<8x4xf32, #tpu.memory_space<vmem>>, vector<8x4xf32>,
    return
  }
  func.func @transform_0(%arg0: i32) -> (i32, i32) {
    %c0_i32 = arith.constant 0 : i32
    %c0_i32_0 = arith.constant 0 : i32
    return %arg0, %c0_i32 : i32, i32
  }
  func.func @transform_1(%arg0: i32) -> (i32, i32) {
    %c0_i32 = arith.constant 0 : i32
    %c0_i32_0 = arith.constant 0 : i32
    %c0_i32_1 = arith.constant 0 : i32
    return %c0_i32, %c0_i32_0 : i32, i32
  }
  func.func @transform_2(%arg0: i32) -> (i32, i32) {
    %c0_i32 = arith.constant 0 : i32
    %c0_i32_0 = arith.constant 0 : i32
    %c0_i32_1 = arith.constant 0 : i32
    return %c0_i32, %c0_i32_0 : i32, i32
  }
  func.func @transform_3(%arg0: i32) -> (i32, i32) {
    %c0_i32 = arith.constant 0 : i32
    %c0_i32_0 = arith.constant 0 : i32
    %c0_i32_1 = arith.constant 0 : i32
    return %c0_i32, %c0_i32_0 : i32, i32
  }
  func.func @transform_4(%arg0: i32) -> (i32, i32) {
    %c0_i32 = arith.constant 0 : i32
    %c0_i32_0 = arith.constant 0 : i32
    %c0_i32_1 = arith.constant 0 : i32
    return %c0_i32, %c0_i32_0 : i32, i32
  }
  func.func @transform_5(%arg0: i32) -> (i32, i32) {
    %c0_i32 = arith.constant 0 : i32
    %c0_i32_0 = arith.constant 0 : i32
    %c0_i32_1 = arith.constant 0 : i32
    return %c0_i32, %c0_i32_0 : i32, i32
  }
  func.func @transform_6(%arg0: i32) -> (i32, i32) {
    %c0_i32 = arith.constant 0 : i32
    %c0_i32_0 = arith.constant 0 : i32
    %c0_i32_1 = arith.constant 0 : i32
    return %c0_i32, %c0_i32_0 : i32, i32
  }
  func.func @transform_7(%arg0: i32) -> (i32, i32) {
    %c0_i32 = arith.constant 0 : i32
    %c0_i32_0 = arith.constant 0 : i32
    return %arg0, %c0_i32 : i32, i32
  }
}

</mosaic_0001>

<bundles_post_ra>
// kernel: tpu_custom_call.1
= control target key start
LH: loop header
LB: loop body
LE: loop exit
PB: predicated region body
PF: predicated region fallthrough
CT: control target
= control target key end

     0   :  { %s783_s24 = smov 0   ;;  %s870_s0 = inlined_call_operand.vmem [shape: f32[16,64], index: 0, kind: input, shape index: {}]   ;;  %s871_s1 = inlined_call_operand.vmem [shape: f32[64,44], index: 1, kind: input, shape index: {}]   ;;  %s872_s2 = inlined_call_operand.vmem [shape: f32[1,44], index: 2, kind: input, shape index: {}]   ;;  %s873_s3 = inlined_call_operand.vmem [shape: f32[44,24], index: 3, kind: input, shape index: {}]   ;;  %s874_s4 = inlined_call_operand.vmem [shape: f32[1,24], index: 4, kind: input, shape index: {}]   ;;  %s875_s5 = inlined_call_operand.vmem [shape: f32[24,4], index: 5, kind: input, shape index: {}]   ;;  %s876_s6 = inlined_call_operand.vmem [shape: f32[1,4], index: 6, kind: input, shape index: {}]   ;;  %s877_s7 = inlined_call_operand.vmem [shape: f32[16,4], index: 7, kind: output, shape index: {}]  }
   0x1 LB: > { %s605_s25 = sadd.s32 4294967295, %s737_s24   ;;  %p609_p0 = scmp.ge.s32.totalorder %s737_s24, 1  ;;  %s737_s24 = sphi %s783_s24, %s17_s24  }
   0x2   : > { %p236_p1 = scmp.lt.s32.totalorder %s737_s24, 3 }
   0x4   : > { %p237_p2 = pnand %p609_p0, %p236_p1 }
   0x5   : > { %v275_v0 = vld [vmem:[%s871_s1] sm:$0xff] (!%p237_p2)  ;;  %v276_v1 = vld [vmem:[%s871_s1 + $0x8] sm:$0xff] (!%p237_p2)  ;;  %v277_v2 = vld [vmem:[%s871_s1 + $0x10] sm:$0xff] (!%p237_p2)  ;;  %v739_v3 = vmov (!%p237_p2), 0.0|0.0   ;;  %vm740_vm0 = vmmov (!%p237_p2), 0   ;;  %v741_v6 = vmov (!%p237_p2), 0.0  }
   0x6   : > { %240 = sbr.rel (%p237_p2) target bundleno = 870 (0x366), region = 48  ;;  %684 = vmatprep.subr.bf16.mxu0 (!%p237_p2), %v739_v3  ;;  %v685_v4 = vpack.c.bf16 (!%p237_p2), %v276_v1, %v275_v0  ;;  %v278_v5 = vld [vmem:[%s871_s1 + $0x18] sm:$0xff] (!%p237_p2)  ;;  %657 = vmatprep.mubr.msk.f32.mxu0 (!%p237_p2), %vm740_vm0, %v741_v6  ;;  %p266_p3 = scmp.lt.s32.totalorder (!%p237_p2), %s605_s25, 1  ;;  %v279_v8 = vld [vmem:[%s871_s1 + $0x20] sm:$0xff] (!%p237_p2)  ;;  %v280_v9 = vld [vmem:[%s871_s1 + $0x28] sm:$0xff] (!%p237_p2)  ;;  %vm290_vm1 = vcmask (!%p237_p2), 523264  }
   0x7   : > { %696 = vmatprep.subr.bf16.mxu1 (!%p237_p2), %v739_v3  ;;  %672 = vmatprep.mubr.msk.f32.mxu1 (!%p237_p2), %vm740_vm0, %v741_v6  ;;  %v688_v7 = vpack.c.bf16 (!%p237_p2), %v278_v5, %v277_v2  ;;  %v691_v10 = vpack.c.bf16 (!%p237_p2), %v280_v9, %v279_v8  ;;  %v281_v11 = vld [vmem:[%s871_s1 + $0x30] sm:$0xff] (!%p237_p2)  ;;  %v282_v12 = vld [vmem:[%s871_s1 + $0x38] sm:$0xff] (!%p237_p2)  ;;  %v365_v15 = vld [vmem:[%s873_s3] sm:$0xff] (!%p237_p2)  ;;  %vm382_vm2 = vcmask (!%p237_p2), 1043456   ;;  %vm742_vm3 = vmmov (!%p237_p2), 1  }
   0x8   : > { %686 = vmatpush3.bf16.msra.mxu0 (!%p237_p2), %v685_v4  ;;  %v694_v13 = vpack.c.bf16 (!%p237_p2), %v282_v12, %v281_v11  ;;  %v366_v16 = vld [vmem:[%s873_s3 + $0x8] sm:$0xff] (!%p237_p2)  ;;  %v367_v18 = vld [vmem:[%s873_s3 + $0x10] sm:$0xff] (!%p237_p2)  ;;  %v368_v19 = vld [vmem:[%s873_s3 + $0x18] sm:$0xff] (!%p237_p2)  ;;  %vm378_vm5 = vcmask (!%p237_p2), 359424   ;;  %vm467_vm6 = vcmask (!%p237_p2), 195584   ;;  %vm544_vm7 = vcmask (!%p237_p2), 31744  }
   0x9   : > { %687 = vmatprep.subr.bf16.mxu0 (!%p237_p2), %v739_v3  ;;  %v697_v17 = vpack.c.bf16 (!%p237_p2), %v366_v16, %v365_v15  ;;  %v700_v20 = vpack.c.bf16 (!%p237_p2), %v368_v19, %v367_v18  ;;  %v369_v21 = vld [vmem:[%s873_s3 + $0x20] sm:$0xff] (!%p237_p2)  ;;  %v370_v22 = vld [vmem:[%s873_s3 + $0x28] sm:$0xf] (!%p237_p2)  ;;  %vm704_vm4 = vmpackc.low (!%p237_p2), %vm382_vm2, %vm742_vm3 }
   0xa   : > { %v703_v23 = vpack.c.bf16 (!%p237_p2), %v370_v22, %v369_v21  ;;  %v612_v24 = vld [vmem:[%s872_s2] ss:$0 sm:$0xff] (!%p237_p2)  ;;  %v458_v30 = vld [vmem:[%s875_s5 + $0x8] sm:$0xff] (!%p237_p2)  ;;  %v459_v32 = vld [vmem:[%s875_s5 + $0x10] sm:$0xff] (!%p237_p2) }
   0xb   : > { %698 = vmatpush3.bf16.msra.mxu1 (!%p237_p2), %v697_v17  ;;  %v457_v29 = vld [vmem:[%s875_s5] sm:$0xff] (!%p237_p2) }
   0xc   : > { %689 = vmatpush3.bf16.msra.mxu0 (!%p237_p2), %v688_v7  ;;  %699 = vmatprep.subr.bf16.mxu1 (!%p237_p2), %v739_v3  ;;  %v707_v31 = vpack.c.bf16 (!%p237_p2), %v458_v30, %v457_v29  ;;  %v614_v33 = vld [vmem:[%s874_s4] ss:$0 sm:$0xff] (!%p237_p2) }
   0xd   : > { %s879_s25 = smov (!%p266_p3, %s605_s25), 1  ;;  %690 = vmatprep.subr.bf16.mxu0 %v739_v3  ;;  %v617_v38 = vld [vmem:[%s876_s6] ss:$0 sm:$0xff] }
   0xe   : > { %s610_s19 = sshll.u32 %s879_s25, 3 }
   0xf   : > { %s269_s22 = scalar_lea.vmem %s870_s0, %s610_s19  ;;  %701 = vmatpush3.bf16.msra.mxu1 %v700_v20  ;;  %s273_s8 = scalar_lea.vmem %s877_s7, %s610_s19 }
  0x10   : > { %692 = vmatpush3.bf16.msra.mxu0 %v691_v10  ;;  %v274_v14 = vld [vmem:[%s269_s22] sm:$0xff]  ;;  %702 = vmatprep.subr.bf16.mxu1 %v739_v3 }
  0x11   : > { %693 = vmatprep.subr.bf16.mxu0 %v739_v3 }
  0x13   : > { %705 = vmatpush3.bf16.msk.msra.mxu1 %vm704_vm4, %v703_v23 }
  0x14   : > { %695 = vmatpush3.bf16.msra.mxu0 %v694_v13  ;;  %706 = vmatprep.subr.bf16.mxu1 %v739_v3 }
  0x17   : > { %658 = vmatmul.mubr.msk.f32.vlgmr.msra.gmra.mrb[0].mxu0 %vm290_vm1, %v274_v14 }
  0xea   : > { %v360_v25 = vpop.f32.mrb[0].mxu0 }
  0xeb   : > { %v361_v26 = vadd.f32 %v612_v24, %v360_v25  ;;  %v659_v27 = vpop.f32.mrb[1].mxu0 }
  0xed   : > { %721 = vtanh.f32 %v361_v26 }
  0xf7   : > { %v722_v28 = vpop.eup %721 }
  0xf8   : > { %673 = vmatmul.mubr.msk.f32.vlgmr.msra.gmra.mrb[0].mxu1 %vm378_vm5, %v722_v28 }
  0xf9   : > { %681 = vmatprep.mubr.msk.f32.mxu1 %vm740_vm0, %v741_v6  ;;  %708 = vmatpush3.bf16.msra.mxu1 %v707_v31 }
  0xfa   : > { %679 = vmatprep.subr.mxu1 %v741_v6 }
  0xfd   : > { %680 = vmatpush3.msra.mxu1 %v459_v32 }
 0x1cb   : > { %v452_v34 = vpop.f32.mrb[0].mxu1 }
 0x1cc   : > { %v453_v35 = vadd.f32 %v614_v33, %v452_v34  ;;  %v674_v36 = vpop.f32.mrb[1].mxu1 }
 0x1ce   : > { %723 = vtanh.f32 %v453_v35 }
 0x1d8   : > { %v724_v37 = vpop.eup %723 }
 0x1d9   : > { %682 = vmatmul.mubr.msk.f32.vlgmr.msra.gmra.mrb[2].mxu1 %vm467_vm6, %v724_v37 }
 0x2ac   : > { %v537_v39 = vpop.f32.mrb[2].mxu1 }
 0x2ad   : > { %v538_v40 = vadd.f32 %v617_v38, %v537_v39  ;;  %v683_v41 = vpop.f32.mrb[3].mxu1 }
 0x2af   : > { %725 = vtanh.f32 %v538_v40 }
 0x2b9   : > { %v726_v42 = vpop.eup %725 }
 0x2ba   : > { %v542_v43 = vmul.f32 1.442695, %v726_v42 }
 0x2bc   : > { %727 = vpow2.f32 %v542_v43 }
 0x2c6   : > { %v728_v44 = vpop.eup %727 }
 0x2c7   : > { %v545_v45 = vsel %vm544_vm7, %v728_v44, 0.0 }
 0x2c8   : > { %546 = vadd.xlane.f32.xlu0 %v545_v45 }
 0x355   : > { %v547_v46 = vpop.xlane.xlu0 %546 }
 0x356   : > { %729 = vlog2.f32 %v547_v46 }
 0x360   : > { %v730_v47 = vpop.eup %729 }
 0x361   : > { %v549_v48 = vmul.f32 0.6931472, %v730_v47 }
 0x363   : > { %v550_v49 = vsub.f32 %v726_v42, %v549_v48 }
 0x365   : > { %551 = vst.msk [vmem:[%s273_s8] sm:$0xff] %vm544_vm7, %v550_v49 }
 0x366 PF: > { %s17_s24 = sadd.s32 1, %s737_s24  }
 0x367   : > { %p14_p4 = scmp.ge.s32.totalorder %s17_s24, 4  }
 0x369   :  { %16 = sbr.rel (!%p14_p4) target bundleno = 1 (0x1), region = 78 }

</bundles_post_ra>
